<compile_context>
chip_gen: v5e
topology: v5e:2x2
jax: 0.10.0
libtpu: 0.0.40
codegen_flags: <defaults>
</compile_context>

<pallas_src>
import numpy as np
import jax
import jax.numpy as jnp
from jax import lax
from jax.experimental import pallas as pl
from jax.experimental.pallas import tpu as pltpu

# ---- deterministic SLAYER neuron / simulation parameters (synthetic) ----
THETA     = 10.0          # params['neuron']['theta']
TAU_SR    = 10.0          # params['neuron']['tauSr']
TAU_REF   = 1.0           # params['neuron']['tauRef']
TS        = 1.0           # params['simulation']['Ts']
POOL_K    = 4             # slayer.pool(4)
POOL_W    = 1.1 * THETA   # _poolLayer conv weight value (per kernel element)
SPIKE_AMP = 1.0 / TS      # spike amplitude produced by getSpikes

# refractory alpha kernel: h[k] = -2*theta*(k*Ts/tauRef)*exp(1 - k*Ts/tauRef)
#                               = REF_C * k * REF_D**k
# -> realized in-kernel with an exact 2-state linear recurrence.
# TODO(synk): slayerCUDA truncates the refractory kernel at |h|<0.01; the
#             recurrence below uses the exact (untruncated) alpha kernel.
REF_D = float(np.exp(-TS / TAU_REF))
REF_C = float(-2.0 * THETA * (TS / TAU_REF) * np.e)


def _srm_kernel(t_sample, ts, tau, eps=0.01):
    """SLAYER _calculateAlphaKernel (mult=1)."""
    vals = []
    for t in np.arange(0.0, t_sample, ts):
        v = t / tau * np.exp(1.0 - t / tau)
        if abs(v) < eps and t > tau:
            break
        vals.append(v)
    return np.asarray(vals, dtype=np.float32)


def _psp_matrix(T, ts, tau):
    """Causal Toeplitz matrix M so that (x @ M)[t] = sum_s x[s] * srm[t-s] * Ts."""
    k = _srm_kernel(T * ts, ts, tau)
    M = np.zeros((T, T), dtype=np.float32)
    for s in range(T):
        for d in range(len(k)):
            t = s + d
            if t < T:
                M[s, t] = k[d] * ts
    return M


def _round_up(x, m):
    return (x + m - 1) // m * m


def sumpool_kernel(x_ref, mt_ref, o_ref, u_ref):
    # x_ref : (16, T, rb) bf16  gathered 4x4 window spikes, rows on the 128-lane axis
    # mt_ref: (T, T)      f32   M^T with the pool weight folded in (u = Mt @ pooled)
    # o_ref : (T, rb)     f32   output spikes (lane-dense stores)
    # u_ref : (T, rb)     f32   VMEM scratch: pooled + psp membrane potential
    x = x_ref[...].astype(jnp.float32)            # cast before arithmetic (v5e: no bf16 VALU)

    # --- pool: sum over the 16 window elements (full-lane VPU adds) ---
    pooled = jnp.sum(x, axis=0)                   # (T, rb)

    # --- psp: causal temporal filter as an MXU matmul, N = rb lane-dense ---
    # pool and psp are both linear, so psp(pool(x)) == pool(psp(x)); POOL_W folded into Mt.
    u_ref[...] = jnp.dot(mt_ref[...], pooled, preferred_element_type=jnp.float32)

    T = o_ref.shape[0]
    rb = o_ref.shape[1]

    # --- spike generation: sequential threshold + alpha refractory recurrence ---
    #   a[t] = sum_{s<=t} d^(t-s) spk[s]
    #   b[t] = sum_{s< t} (t-s) d^(t-s) spk[s]   -> refractory term = REF_C * b[t]
    def step(t, carry):
        a, b = carry                              # each (1, rb) full-lane rows
        b = REF_D * (b + a)
        u_eff = u_ref[pl.ds(t, 1), :] + REF_C * b
        spk = (u_eff >= THETA).astype(jnp.float32)
        a = REF_D * a + spk
        out = spk if SPIKE_AMP == 1.0 else spk * SPIKE_AMP
        o_ref[pl.ds(t, 1), :] = out               # direct per-timestep store, no concat
        return a, b

    zeros = jnp.zeros((1, rb), jnp.float32)
    lax.fori_loop(0, T, step, (zeros, zeros), unroll=True)


def sum_pool_forward(x, *, row_block=512):
    """x: (N, C, H, W, T) float32 spike tensor (NCHWT). Returns (N, C, H/4, W/4, T)."""
    N, C, H, W, T = x.shape
    assert H % POOL_K == 0 and W % POOL_K == 0, "H, W must be divisible by 4"
    Hp, Wp = H // POOL_K, W // POOL_K
    R = N * C * Hp * Wp

    # choose rb: multiple of 128 (lane axis), as large as row_block allows, but keep
    # the grid at >= 2 steps when possible so megacore parallelism (v7x) isn't lost.
    R128 = _round_up(R, 128)
    rb = max(128, min(_round_up(row_block, 128), R128))
    rb = (rb // 128) * 128
    if R128 // rb < 2 and R128 >= 256:
        rb = max(128, ((R128 // 2) // 128) * 128)
    R_pad = _round_up(R128, rb)

    # glue: gather 4x4 pooling windows into (16, T, R) with rows on the lane axis
    xw = x.reshape(N, C, Hp, POOL_K, Wp, POOL_K, T)
    xw = xw.transpose(3, 5, 6, 0, 1, 2, 4).reshape(POOL_K * POOL_K, T, R)
    if R_pad != R:
        xw = jnp.pad(xw, ((0, 0), (0, 0), (0, R_pad - R)))   # padded rows -> zero spikes
    xw = xw.astype(jnp.bfloat16)          # spikes are 0/1 -> exact; halves input HBM traffic

    # psp Toeplitz, transposed for (T, rb) layout, with pool weight folded in
    mt = jnp.asarray(_psp_matrix(T, TS, TAU_SR).T * POOL_W, dtype=jnp.float32)

    # explicit VMEM budget: double-buffered blocks + scratch, with headroom, capped well
    # under v7x's 64 MiB physical VMEM.
    blk_bytes = (2 * (POOL_K * POOL_K * T * rb * 2)   # bf16 input blocks
                 + 2 * (T * rb * 4)                   # f32 output blocks
                 + 2 * (T * T * 4)                    # psp matrix
                 + (T * rb * 4))                      # u scratch
    vmem_limit = int(min(max(4 * blk_bytes, 16 * 1024 * 1024), 48 * 1024 * 1024))

    out = pl.pallas_call(
        sumpool_kernel,
        out_shape=jax.ShapeDtypeStruct((T, R_pad), jnp.float32),
        grid_spec=pltpu.PrefetchScalarGridSpec(
            num_scalar_prefetch=0,
            grid=(R_pad // rb,),
            in_specs=[
                pl.BlockSpec((POOL_K * POOL_K, T, rb), lambda i: (0, 0, i)),
                pl.BlockSpec((T, T), lambda i: (0, 0)),
            ],
            out_specs=pl.BlockSpec((T, rb), lambda i: (0, i)),
            scratch_shapes=[pltpu.VMEM((T, rb), jnp.float32)],
        ),
        compiler_params=pltpu.CompilerParams(
            dimension_semantics=("parallel",),
            vmem_limit_bytes=vmem_limit,
        ),
    )(xw, mt)

    out = out[:, :R]                       # drop padded rows
    return out.T.reshape(N, C, Hp, Wp, T)  # back to NCHWT


if __name__ == "__main__":
    key = jax.random.PRNGKey(0)
    N, C, H, W, T = 2, 2, 32, 32, 16       # R = N*C*(H/4)*(W/4) = 256 -> 2 grid steps
    x = jax.random.bernoulli(key, p=0.3, shape=(N, C, H, W, T)).astype(jnp.float32)

    out = sum_pool_forward(x)
    out = jax.block_until_ready(out)

    assert out.shape == (N, C, H // POOL_K, W // POOL_K, T)
    assert out.dtype == jnp.float32
    # spike outputs are either 0 or 1/Ts
    assert bool(jnp.all((out == 0.0) | (out == SPIKE_AMP)))
    print("KERNEL_OK")
</pallas_src>

<mosaic_0001>
module attributes {stable_mosaic.version = 11 : i64} {
  func.func @sumpool_kernel(%arg0: i32, %arg1: memref<16x16x128xbf16, #tpu.memory_space<vmem>>, %arg2: memref<16x16xf32, #tpu.memory_space<vmem>>, %arg3: memref<16x128xf32, #tpu.memory_space<vmem>>, %arg4: memref<16x128xf32, #tpu.memory_space<vmem>>) attributes {dimension_semantics = [#tpu.dimension_semantics<parallel>], iteration_bounds = array<i64: 2>, scalar_prefetch = 0 : i64, scratch_operands = 1 : i64, tpu.core_type = #tpu.core_type<tc>, window_params = [{transform_indices = @transform_0, window_bounds = array<i64: 16, 16, 128>}, {pipeline_mode = #tpu.pipeline_mode<synchronous>, transform_indices = @transform_1, window_bounds = array<i64: 16, 16>}, {transform_indices = @transform_2, window_bounds = array<i64: 16, 128>}]} {
    %c0 = arith.constant 0 : index
    %c0_0 = arith.constant 0 : index
    %c0_1 = arith.constant 0 : index
    %0 = vector.load %arg1[%c0, %c0_0, %c0_1] : memref<16x16x128xbf16, #tpu.memory_space<vmem>>, vector<16x16x128xbf16>
    %1 = arith.extf %0 : vector<16x16x128xbf16> to vector<16x16x128xf32>
    %cst = arith.constant dense<0.000000e+00> : vector<16x128xf32>
    %2 = vector.multi_reduction <add>, %1, %cst [0] : vector<16x16x128xf32> to vector<16x128xf32>
    %c0_2 = arith.constant 0 : index
    %c0_3 = arith.constant 0 : index
    %3 = vector.load %arg2[%c0_2, %c0_3] : memref<16x16xf32, #tpu.memory_space<vmem>>, vector<16x16xf32>
    %cst_4 = arith.constant dense<0.000000e+00> : vector<16x128xf32>
    %4 = tpu.matmul %3, %2, %cst_4 {dimension_numbers = #tpu.dot_dimension_numbers<[1], [0], [0], [1], [0, 0, 1, 1], [], []>} : vector<16x16xf32>, vector<16x128xf32>, vector<16x128xf32> -> vector<16x128xf32>
    %c0_5 = arith.constant 0 : index
    %c0_6 = arith.constant 0 : index
    %5 = vector.load %arg4[%c0_5, %c0_6] : memref<16x128xf32, #tpu.memory_space<vmem>>, vector<16x128xf32>
    tpu.vector_store %arg4[%c0_5, %c0_6], %4 {strides = array<i32>} : memref<16x128xf32, #tpu.memory_space<vmem>>, vector<16x128xf32>,
    %cst_7 = arith.constant 0.000000e+00 : f32
    %6 = vector.broadcast %cst_7 : f32 to vector<1x128xf32>
    %c0_i32 = arith.constant 0 : i32
    %7 = arith.addf %6, %6 : vector<1x128xf32>
    %cst_8 = arith.constant 0.36787945 : f32
    %8 = vector.broadcast %cst_8 : f32 to vector<1x128xf32>
    %9 = arith.mulf %8, %7 : vector<1x128xf32>
    %10 = arith.index_cast %c0_i32 : i32 to index
    %c0_9 = arith.constant 0 : index
    %11 = vector.load %arg4[%10, %c0_9] : memref<16x128xf32, #tpu.memory_space<vmem>>, vector<1x128xf32>
    %cst_10 = arith.constant -54.3656349 : f32
    %12 = vector.broadcast %cst_10 : f32 to vector<1x128xf32>
    %13 = arith.mulf %12, %9 : vector<1x128xf32>
    %14 = arith.addf %11, %13 : vector<1x128xf32>
    %cst_11 = arith.constant 1.000000e+01 : f32
    %15 = vector.broadcast %cst_11 : f32 to vector<1x128xf32>
    %16 = arith.cmpf oge, %14, %15 : vector<1x128xf32>
    %17 = arith.extui %16 : vector<1x128xi1> to vector<1x128xi32>
    %18 = arith.sitofp %17 : vector<1x128xi32> to vector<1x128xf32>
    %cst_12 = arith.constant 0.36787945 : f32
    %19 = vector.broadcast %cst_12 : f32 to vector<1x128xf32>
    %20 = arith.mulf %19, %6 : vector<1x128xf32>
    %21 = arith.addf %20, %18 : vector<1x128xf32>
    %22 = arith.index_cast %c0_i32 : i32 to index
    %c0_13 = arith.constant 0 : index
    %23 = vector.load %arg3[%22, %c0_13] : memref<16x128xf32, #tpu.memory_space<vmem>>, vector<1x128xf32>
    tpu.vector_store %arg3[%22, %c0_13], %18 {strides = array<i32>} : memref<16x128xf32, #tpu.memory_space<vmem>>, vector<1x128xf32>,
    %c1_i32 = arith.constant 1 : i32
    %24 = arith.addf %9, %21 : vector<1x128xf32>
    %cst_14 = arith.constant 0.36787945 : f32
    %25 = vector.broadcast %cst_14 : f32 to vector<1x128xf32>
    %26 = arith.mulf %25, %24 : vector<1x128xf32>
    %27 = arith.index_cast %c1_i32 : i32 to index
    %c0_15 = arith.constant 0 : index
    %28 = vector.load %arg4[%27, %c0_15] : memref<16x128xf32, #tpu.memory_space<vmem>>, vector<1x128xf32>
    %cst_16 = arith.constant -54.3656349 : f32
    %29 = vector.broadcast %cst_16 : f32 to vector<1x128xf32>
    %30 = arith.mulf %29, %26 : vector<1x128xf32>
    %31 = arith.addf %28, %30 : vector<1x128xf32>
    %cst_17 = arith.constant 1.000000e+01 : f32
    %32 = vector.broadcast %cst_17 : f32 to vector<1x128xf32>
    %33 = arith.cmpf oge, %31, %32 : vector<1x128xf32>
    %34 = arith.extui %33 : vector<1x128xi1> to vector<1x128xi32>
    %35 = arith.sitofp %34 : vector<1x128xi32> to vector<1x128xf32>
    %cst_18 = arith.constant 0.36787945 : f32
    %36 = vector.broadcast %cst_18 : f32 to vector<1x128xf32>
    %37 = arith.mulf %36, %21 : vector<1x128xf32>
    %38 = arith.addf %37, %35 : vector<1x128xf32>
    %39 = arith.index_cast %c1_i32 : i32 to index
    %c0_19 = arith.constant 0 : index
    %40 = vector.load %arg3[%39, %c0_19] : memref<16x128xf32, #tpu.memory_space<vmem>>, vector<1x128xf32>
    tpu.vector_store %arg3[%39, %c0_19], %35 {strides = array<i32>} : memref<16x128xf32, #tpu.memory_space<vmem>>, vector<1x128xf32>,
    %c2_i32 = arith.constant 2 : i32
    %41 = arith.addf %26, %38 : vector<1x128xf32>
    %cst_20 = arith.constant 0.36787945 : f32
    %42 = vector.broadcast %cst_20 : f32 to vector<1x128xf32>
    %43 = arith.mulf %42, %41 : vector<1x128xf32>
    %44 = arith.index_cast %c2_i32 : i32 to index
    %c0_21 = arith.constant 0 : index
    %45 = vector.load %arg4[%44, %c0_21] : memref<16x128xf32, #tpu.memory_space<vmem>>, vector<1x128xf32>
    %cst_22 = arith.constant -54.3656349 : f32
    %46 = vector.broadcast %cst_22 : f32 to vector<1x128xf32>
    %47 = arith.mulf %46, %43 : vector<1x128xf32>
    %48 = arith.addf %45, %47 : vector<1x128xf32>
    %cst_23 = arith.constant 1.000000e+01 : f32
    %49 = vector.broadcast %cst_23 : f32 to vector<1x128xf32>
    %50 = arith.cmpf oge, %48, %49 : vector<1x128xf32>
    %51 = arith.extui %50 : vector<1x128xi1> to vector<1x128xi32>
    %52 = arith.sitofp %51 : vector<1x128xi32> to vector<1x128xf32>
    %cst_24 = arith.constant 0.36787945 : f32
    %53 = vector.broadcast %cst_24 : f32 to vector<1x128xf32>
    %54 = arith.mulf %53, %38 : vector<1x128xf32>
    %55 = arith.addf %54, %52 : vector<1x128xf32>
    %56 = arith.index_cast %c2_i32 : i32 to index
    %c0_25 = arith.constant 0 : index
    %57 = vector.load %arg3[%56, %c0_25] : memref<16x128xf32, #tpu.memory_space<vmem>>, vector<1x128xf32>
    tpu.vector_store %arg3[%56, %c0_25], %52 {strides = array<i32>} : memref<16x128xf32, #tpu.memory_space<vmem>>, vector<1x128xf32>,
    %c3_i32 = arith.constant 3 : i32
    %58 = arith.addf %43, %55 : vector<1x128xf32>
    %cst_26 = arith.constant 0.36787945 : f32
    %59 = vector.broadcast %cst_26 : f32 to vector<1x128xf32>
    %60 = arith.mulf %59, %58 : vector<1x128xf32>
    %61 = arith.index_cast %c3_i32 : i32 to index
    %c0_27 = arith.constant 0 : index
    %62 = vector.load %arg4[%61, %c0_27] : memref<16x128xf32, #tpu.memory_space<vmem>>, vector<1x128xf32>
    %cst_28 = arith.constant -54.3656349 : f32
    %63 = vector.broadcast %cst_28 : f32 to vector<1x128xf32>
    %64 = arith.mulf %63, %60 : vector<1x128xf32>
    %65 = arith.addf %62, %64 : vector<1x128xf32>
    %cst_29 = arith.constant 1.000000e+01 : f32
    %66 = vector.broadcast %cst_29 : f32 to vector<1x128xf32>
    %67 = arith.cmpf oge, %65, %66 : vector<1x128xf32>
    %68 = arith.extui %67 : vector<1x128xi1> to vector<1x128xi32>
    %69 = arith.sitofp %68 : vector<1x128xi32> to vector<1x128xf32>
    %cst_30 = arith.constant 0.36787945 : f32
    %70 = vector.broadcast %cst_30 : f32 to vector<1x128xf32>
    %71 = arith.mulf %70, %55 : vector<1x128xf32>
    %72 = arith.addf %71, %69 : vector<1x128xf32>
    %73 = arith.index_cast %c3_i32 : i32 to index
    %c0_31 = arith.constant 0 : index
    %74 = vector.load %arg3[%73, %c0_31] : memref<16x128xf32, #tpu.memory_space<vmem>>, vector<1x128xf32>
    tpu.vector_store %arg3[%73, %c0_31], %69 {strides = array<i32>} : memref<16x128xf32, #tpu.memory_space<vmem>>, vector<1x128xf32>,
    %c4_i32 = arith.constant 4 : i32
    %75 = arith.addf %60, %72 : vector<1x128xf32>
    %cst_32 = arith.constant 0.36787945 : f32
    %76 = vector.broadcast %cst_32 : f32 to vector<1x128xf32>
    %77 = arith.mulf %76, %75 : vector<1x128xf32>
    %78 = arith.index_cast %c4_i32 : i32 to index
    %c0_33 = arith.constant 0 : index
    %79 = vector.load %arg4[%78, %c0_33] : memref<16x128xf32, #tpu.memory_space<vmem>>, vector<1x128xf32>
    %cst_34 = arith.constant -54.3656349 : f32
    %80 = vector.broadcast %cst_34 : f32 to vector<1x128xf32>
    %81 = arith.mulf %80, %77 : vector<1x128xf32>
    %82 = arith.addf %79, %81 : vector<1x128xf32>
    %cst_35 = arith.constant 1.000000e+01 : f32
    %83 = vector.broadcast %cst_35 : f32 to vector<1x128xf32>
    %84 = arith.cmpf oge, %82, %83 : vector<1x128xf32>
    %85 = arith.extui %84 : vector<1x128xi1> to vector<1x128xi32>
    %86 = arith.sitofp %85 : vector<1x128xi32> to vector<1x128xf32>
    %cst_36 = arith.constant 0.36787945 : f32
    %87 = vector.broadcast %cst_36 : f32 to vector<1x128xf32>
    %88 = arith.mulf %87, %72 : vector<1x128xf32>
    %89 = arith.addf %88, %86 : vector<1x128xf32>
    %90 = arith.index_cast %c4_i32 : i32 to index
    %c0_37 = arith.constant 0 : index
    %91 = vector.load %arg3[%90, %c0_37] : memref<16x128xf32, #tpu.memory_space<vmem>>, vector<1x128xf32>
    tpu.vector_store %arg3[%90, %c0_37], %86 {strides = array<i32>} : memref<16x128xf32, #tpu.memory_space<vmem>>, vector<1x128xf32>,
    %c5_i32 = arith.constant 5 : i32
    %92 = arith.addf %77, %89 : vector<1x128xf32>
    %cst_38 = arith.constant 0.36787945 : f32
    %93 = vector.broadcast %cst_38 : f32 to vector<1x128xf32>
    %94 = arith.mulf %93, %92 : vector<1x128xf32>
    %95 = arith.index_cast %c5_i32 : i32 to index
    %c0_39 = arith.constant 0 : index
    %96 = vector.load %arg4[%95, %c0_39] : memref<16x128xf32, #tpu.memory_space<vmem>>, vector<1x128xf32>
    %cst_40 = arith.constant -54.3656349 : f32
    %97 = vector.broadcast %cst_40 : f32 to vector<1x128xf32>
    %98 = arith.mulf %97, %94 : vector<1x128xf32>
    %99 = arith.addf %96, %98 : vector<1x128xf32>
    %cst_41 = arith.constant 1.000000e+01 : f32
    %100 = vector.broadcast %cst_41 : f32 to vector<1x128xf32>
    %101 = arith.cmpf oge, %99, %100 : vector<1x128xf32>
    %102 = arith.extui %101 : vector<1x128xi1> to vector<1x128xi32>
    %103 = arith.sitofp %102 : vector<1x128xi32> to vector<1x128xf32>
    %cst_42 = arith.constant 0.36787945 : f32
    %104 = vector.broadcast %cst_42 : f32 to vector<1x128xf32>
    %105 = arith.mulf %104, %89 : vector<1x128xf32>
    %106 = arith.addf %105, %103 : vector<1x128xf32>
    %107 = arith.index_cast %c5_i32 : i32 to index
    %c0_43 = arith.constant 0 : index
    %108 = vector.load %arg3[%107, %c0_43] : memref<16x128xf32, #tpu.memory_space<vmem>>, vector<1x128xf32>
    tpu.vector_store %arg3[%107, %c0_43], %103 {strides = array<i32>} : memref<16x128xf32, #tpu.memory_space<vmem>>, vector<1x128xf32>,
    %c6_i32 = arith.constant 6 : i32
    %109 = arith.addf %94, %106 : vector<1x128xf32>
    %cst_44 = arith.constant 0.36787945 : f32
    %110 = vector.broadcast %cst_44 : f32 to vector<1x128xf32>
    %111 = arith.mulf %110, %109 : vector<1x128xf32>
    %112 = arith.index_cast %c6_i32 : i32 to index
    %c0_45 = arith.constant 0 : index
    %113 = vector.load %arg4[%112, %c0_45] : memref<16x128xf32, #tpu.memory_space<vmem>>, vector<1x128xf32>
    %cst_46 = arith.constant -54.3656349 : f32
    %114 = vector.broadcast %cst_46 : f32 to vector<1x128xf32>
    %115 = arith.mulf %114, %111 : vector<1x128xf32>
    %116 = arith.addf %113, %115 : vector<1x128xf32>
    %cst_47 = arith.constant 1.000000e+01 : f32
    %117 = vector.broadcast %cst_47 : f32 to vector<1x128xf32>
    %118 = arith.cmpf oge, %116, %117 : vector<1x128xf32>
    %119 = arith.extui %118 : vector<1x128xi1> to vector<1x128xi32>
    %120 = arith.sitofp %119 : vector<1x128xi32> to vector<1x128xf32>
    %cst_48 = arith.constant 0.36787945 : f32
    %121 = vector.broadcast %cst_48 : f32 to vector<1x128xf32>
    %122 = arith.mulf %121, %106 : vector<1x128xf32>
    %123 = arith.addf %122, %120 : vector<1x128xf32>
    %124 = arith.index_cast %c6_i32 : i32 to index
    %c0_49 = arith.constant 0 : index
    %125 = vector.load %arg3[%124, %c0_49] : memref<16x128xf32, #tpu.memory_space<vmem>>, vector<1x128xf32>
    tpu.vector_store %arg3[%124, %c0_49], %120 {strides = array<i32>} : memref<16x128xf32, #tpu.memory_space<vmem>>, vector<1x128xf32>,
    %c7_i32 = arith.constant 7 : i32
    %126 = arith.addf %111, %123 : vector<1x128xf32>
    %cst_50 = arith.constant 0.36787945 : f32
    %127 = vector.broadcast %cst_50 : f32 to vector<1x128xf32>
    %128 = arith.mulf %127, %126 : vector<1x128xf32>
    %129 = arith.index_cast %c7_i32 : i32 to index
    %c0_51 = arith.constant 0 : index
    %130 = vector.load %arg4[%129, %c0_51] : memref<16x128xf32, #tpu.memory_space<vmem>>, vector<1x128xf32>
    %cst_52 = arith.constant -54.3656349 : f32
    %131 = vector.broadcast %cst_52 : f32 to vector<1x128xf32>
    %132 = arith.mulf %131, %128 : vector<1x128xf32>
    %133 = arith.addf %130, %132 : vector<1x128xf32>
    %cst_53 = arith.constant 1.000000e+01 : f32
    %134 = vector.broadcast %cst_53 : f32 to vector<1x128xf32>
    %135 = arith.cmpf oge, %133, %134 : vector<1x128xf32>
    %136 = arith.extui %135 : vector<1x128xi1> to vector<1x128xi32>
    %137 = arith.sitofp %136 : vector<1x128xi32> to vector<1x128xf32>
    %cst_54 = arith.constant 0.36787945 : f32
    %138 = vector.broadcast %cst_54 : f32 to vector<1x128xf32>
    %139 = arith.mulf %138, %123 : vector<1x128xf32>
    %140 = arith.addf %139, %137 : vector<1x128xf32>
    %141 = arith.index_cast %c7_i32 : i32 to index
    %c0_55 = arith.constant 0 : index
    %142 = vector.load %arg3[%141, %c0_55] : memref<16x128xf32, #tpu.memory_space<vmem>>, vector<1x128xf32>
    tpu.vector_store %arg3[%141, %c0_55], %137 {strides = array<i32>} : memref<16x128xf32, #tpu.memory_space<vmem>>, vector<1x128xf32>,
    %c8_i32 = arith.constant 8 : i32
    %143 = arith.addf %128, %140 : vector<1x128xf32>
    %cst_56 = arith.constant 0.36787945 : f32
    %144 = vector.broadcast %cst_56 : f32 to vector<1x128xf32>
    %145 = arith.mulf %144, %143 : vector<1x128xf32>
    %146 = arith.index_cast %c8_i32 : i32 to index
    %c0_57 = arith.constant 0 : index
    %147 = vector.load %arg4[%146, %c0_57] : memref<16x128xf32, #tpu.memory_space<vmem>>, vector<1x128xf32>
    %cst_58 = arith.constant -54.3656349 : f32
    %148 = vector.broadcast %cst_58 : f32 to vector<1x128xf32>
    %149 = arith.mulf %148, %145 : vector<1x128xf32>
    %150 = arith.addf %147, %149 : vector<1x128xf32>
    %cst_59 = arith.constant 1.000000e+01 : f32
    %151 = vector.broadcast %cst_59 : f32 to vector<1x128xf32>
    %152 = arith.cmpf oge, %150, %151 : vector<1x128xf32>
    %153 = arith.extui %152 : vector<1x128xi1> to vector<1x128xi32>
    %154 = arith.sitofp %153 : vector<1x128xi32> to vector<1x128xf32>
    %cst_60 = arith.constant 0.36787945 : f32
    %155 = vector.broadcast %cst_60 : f32 to vector<1x128xf32>
    %156 = arith.mulf %155, %140 : vector<1x128xf32>
    %157 = arith.addf %156, %154 : vector<1x128xf32>
    %158 = arith.index_cast %c8_i32 : i32 to index
    %c0_61 = arith.constant 0 : index
    %159 = vector.load %arg3[%158, %c0_61] : memref<16x128xf32, #tpu.memory_space<vmem>>, vector<1x128xf32>
    tpu.vector_store %arg3[%158, %c0_61], %154 {strides = array<i32>} : memref<16x128xf32, #tpu.memory_space<vmem>>, vector<1x128xf32>,
    %c9_i32 = arith.constant 9 : i32
    %160 = arith.addf %145, %157 : vector<1x128xf32>
    %cst_62 = arith.constant 0.36787945 : f32
    %161 = vector.broadcast %cst_62 : f32 to vector<1x128xf32>
    %162 = arith.mulf %161, %160 : vector<1x128xf32>
    %163 = arith.index_cast %c9_i32 : i32 to index
    %c0_63 = arith.constant 0 : index
    %164 = vector.load %arg4[%163, %c0_63] : memref<16x128xf32, #tpu.memory_space<vmem>>, vector<1x128xf32>
    %cst_64 = arith.constant -54.3656349 : f32
    %165 = vector.broadcast %cst_64 : f32 to vector<1x128xf32>
    %166 = arith.mulf %165, %162 : vector<1x128xf32>
    %167 = arith.addf %164, %166 : vector<1x128xf32>
    %cst_65 = arith.constant 1.000000e+01 : f32
    %168 = vector.broadcast %cst_65 : f32 to vector<1x128xf32>
    %169 = arith.cmpf oge, %167, %168 : vector<1x128xf32>
    %170 = arith.extui %169 : vector<1x128xi1> to vector<1x128xi32>
    %171 = arith.sitofp %170 : vector<1x128xi32> to vector<1x128xf32>
    %cst_66 = arith.constant 0.36787945 : f32
    %172 = vector.broadcast %cst_66 : f32 to vector<1x128xf32>
    %173 = arith.mulf %172, %157 : vector<1x128xf32>
    %174 = arith.addf %173, %171 : vector<1x128xf32>
    %175 = arith.index_cast %c9_i32 : i32 to index
    %c0_67 = arith.constant 0 : index
    %176 = vector.load %arg3[%175, %c0_67] : memref<16x128xf32, #tpu.memory_space<vmem>>, vector<1x128xf32>
    tpu.vector_store %arg3[%175, %c0_67], %171 {strides = array<i32>} : memref<16x128xf32, #tpu.memory_space<vmem>>, vector<1x128xf32>,
    %c10_i32 = arith.constant 10 : i32
    %177 = arith.addf %162, %174 : vector<1x128xf32>
    %cst_68 = arith.constant 0.36787945 : f32
    %178 = vector.broadcast %cst_68 : f32 to vector<1x128xf32>
    %179 = arith.mulf %178, %177 : vector<1x128xf32>
    %180 = arith.index_cast %c10_i32 : i32 to index
    %c0_69 = arith.constant 0 : index
    %181 = vector.load %arg4[%180, %c0_69] : memref<16x128xf32, #tpu.memory_space<vmem>>, vector<1x128xf32>
    %cst_70 = arith.constant -54.3656349 : f32
    %182 = vector.broadcast %cst_70 : f32 to vector<1x128xf32>
    %183 = arith.mulf %182, %179 : vector<1x128xf32>
    %184 = arith.addf %181, %183 : vector<1x128xf32>
    %cst_71 = arith.constant 1.000000e+01 : f32
    %185 = vector.broadcast %cst_71 : f32 to vector<1x128xf32>
    %186 = arith.cmpf oge, %184, %185 : vector<1x128xf32>
    %187 = arith.extui %186 : vector<1x128xi1> to vector<1x128xi32>
    %188 = arith.sitofp %187 : vector<1x128xi32> to vector<1x128xf32>
    %cst_72 = arith.constant 0.36787945 : f32
    %189 = vector.broadcast %cst_72 : f32 to vector<1x128xf32>
    %190 = arith.mulf %189, %174 : vector<1x128xf32>
    %191 = arith.addf %190, %188 : vector<1x128xf32>
    %192 = arith.index_cast %c10_i32 : i32 to index
    %c0_73 = arith.constant 0 : index
    %193 = vector.load %arg3[%192, %c0_73] : memref<16x128xf32, #tpu.memory_space<vmem>>, vector<1x128xf32>
    tpu.vector_store %arg3[%192, %c0_73], %188 {strides = array<i32>} : memref<16x128xf32, #tpu.memory_space<vmem>>, vector<1x128xf32>,
    %c11_i32 = arith.constant 11 : i32
    %194 = arith.addf %179, %191 : vector<1x128xf32>
    %cst_74 = arith.constant 0.36787945 : f32
    %195 = vector.broadcast %cst_74 : f32 to vector<1x128xf32>
    %196 = arith.mulf %195, %194 : vector<1x128xf32>
    %197 = arith.index_cast %c11_i32 : i32 to index
    %c0_75 = arith.constant 0 : index
    %198 = vector.load %arg4[%197, %c0_75] : memref<16x128xf32, #tpu.memory_space<vmem>>, vector<1x128xf32>
    %cst_76 = arith.constant -54.3656349 : f32
    %199 = vector.broadcast %cst_76 : f32 to vector<1x128xf32>
    %200 = arith.mulf %199, %196 : vector<1x128xf32>
    %201 = arith.addf %198, %200 : vector<1x128xf32>
    %cst_77 = arith.constant 1.000000e+01 : f32
    %202 = vector.broadcast %cst_77 : f32 to vector<1x128xf32>
    %203 = arith.cmpf oge, %201, %202 : vector<1x128xf32>
    %204 = arith.extui %203 : vector<1x128xi1> to vector<1x128xi32>
    %205 = arith.sitofp %204 : vector<1x128xi32> to vector<1x128xf32>
    %cst_78 = arith.constant 0.36787945 : f32
    %206 = vector.broadcast %cst_78 : f32 to vector<1x128xf32>
    %207 = arith.mulf %206, %191 : vector<1x128xf32>
    %208 = arith.addf %207, %205 : vector<1x128xf32>
    %209 = arith.index_cast %c11_i32 : i32 to index
    %c0_79 = arith.constant 0 : index
    %210 = vector.load %arg3[%209, %c0_79] : memref<16x128xf32, #tpu.memory_space<vmem>>, vector<1x128xf32>
    tpu.vector_store %arg3[%209, %c0_79], %205 {strides = array<i32>} : memref<16x128xf32, #tpu.memory_space<vmem>>, vector<1x128xf32>,
    %c12_i32 = arith.constant 12 : i32
    %211 = arith.addf %196, %208 : vector<1x128xf32>
    %cst_80 = arith.constant 0.36787945 : f32
    %212 = vector.broadcast %cst_80 : f32 to vector<1x128xf32>
    %213 = arith.mulf %212, %211 : vector<1x128xf32>
    %214 = arith.index_cast %c12_i32 : i32 to index
    %c0_81 = arith.constant 0 : index
    %215 = vector.load %arg4[%214, %c0_81] : memref<16x128xf32, #tpu.memory_space<vmem>>, vector<1x128xf32>
    %cst_82 = arith.constant -54.3656349 : f32
    %216 = vector.broadcast %cst_82 : f32 to vector<1x128xf32>
    %217 = arith.mulf %216, %213 : vector<1x128xf32>
    %218 = arith.addf %215, %217 : vector<1x128xf32>
    %cst_83 = arith.constant 1.000000e+01 : f32
    %219 = vector.broadcast %cst_83 : f32 to vector<1x128xf32>
    %220 = arith.cmpf oge, %218, %219 : vector<1x128xf32>
    %221 = arith.extui %220 : vector<1x128xi1> to vector<1x128xi32>
    %222 = arith.sitofp %221 : vector<1x128xi32> to vector<1x128xf32>
    %cst_84 = arith.constant 0.36787945 : f32
    %223 = vector.broadcast %cst_84 : f32 to vector<1x128xf32>
    %224 = arith.mulf %223, %208 : vector<1x128xf32>
    %225 = arith.addf %224, %222 : vector<1x128xf32>
    %226 = arith.index_cast %c12_i32 : i32 to index
    %c0_85 = arith.constant 0 : index
    %227 = vector.load %arg3[%226, %c0_85] : memref<16x128xf32, #tpu.memory_space<vmem>>, vector<1x128xf32>
    tpu.vector_store %arg3[%226, %c0_85], %222 {strides = array<i32>} : memref<16x128xf32, #tpu.memory_space<vmem>>, vector<1x128xf32>,
    %c13_i32 = arith.constant 13 : i32
    %228 = arith.addf %213, %225 : vector<1x128xf32>
    %cst_86 = arith.constant 0.36787945 : f32
    %229 = vector.broadcast %cst_86 : f32 to vector<1x128xf32>
    %230 = arith.mulf %229, %228 : vector<1x128xf32>
    %231 = arith.index_cast %c13_i32 : i32 to index
    %c0_87 = arith.constant 0 : index
    %232 = vector.load %arg4[%231, %c0_87] : memref<16x128xf32, #tpu.memory_space<vmem>>, vector<1x128xf32>
    %cst_88 = arith.constant -54.3656349 : f32
    %233 = vector.broadcast %cst_88 : f32 to vector<1x128xf32>
    %234 = arith.mulf %233, %230 : vector<1x128xf32>
    %235 = arith.addf %232, %234 : vector<1x128xf32>
    %cst_89 = arith.constant 1.000000e+01 : f32
    %236 = vector.broadcast %cst_89 : f32 to vector<1x128xf32>
    %237 = arith.cmpf oge, %235, %236 : vector<1x128xf32>
    %238 = arith.extui %237 : vector<1x128xi1> to vector<1x128xi32>
    %239 = arith.sitofp %238 : vector<1x128xi32> to vector<1x128xf32>
    %cst_90 = arith.constant 0.36787945 : f32
    %240 = vector.broadcast %cst_90 : f32 to vector<1x128xf32>
    %241 = arith.mulf %240, %225 : vector<1x128xf32>
    %242 = arith.addf %241, %239 : vector<1x128xf32>
    %243 = arith.index_cast %c13_i32 : i32 to index
    %c0_91 = arith.constant 0 : index
    %244 = vector.load %arg3[%243, %c0_91] : memref<16x128xf32, #tpu.memory_space<vmem>>, vector<1x128xf32>
    tpu.vector_store %arg3[%243, %c0_91], %239 {strides = array<i32>} : memref<16x128xf32, #tpu.memory_space<vmem>>, vector<1x128xf32>,
    %c14_i32 = arith.constant 14 : i32
    %245 = arith.addf %230, %242 : vector<1x128xf32>
    %cst_92 = arith.constant 0.36787945 : f32
    %246 = vector.broadcast %cst_92 : f32 to vector<1x128xf32>
    %247 = arith.mulf %246, %245 : vector<1x128xf32>
    %248 = arith.index_cast %c14_i32 : i32 to index
    %c0_93 = arith.constant 0 : index
    %249 = vector.load %arg4[%248, %c0_93] : memref<16x128xf32, #tpu.memory_space<vmem>>, vector<1x128xf32>
    %cst_94 = arith.constant -54.3656349 : f32
    %250 = vector.broadcast %cst_94 : f32 to vector<1x128xf32>
    %251 = arith.mulf %250, %247 : vector<1x128xf32>
    %252 = arith.addf %249, %251 : vector<1x128xf32>
    %cst_95 = arith.constant 1.000000e+01 : f32
    %253 = vector.broadcast %cst_95 : f32 to vector<1x128xf32>
    %254 = arith.cmpf oge, %252, %253 : vector<1x128xf32>
    %255 = arith.extui %254 : vector<1x128xi1> to vector<1x128xi32>
    %256 = arith.sitofp %255 : vector<1x128xi32> to vector<1x128xf32>
    %cst_96 = arith.constant 0.36787945 : f32
    %257 = vector.broadcast %cst_96 : f32 to vector<1x128xf32>
    %258 = arith.mulf %257, %242 : vector<1x128xf32>
    %259 = arith.addf %258, %256 : vector<1x128xf32>
    %260 = arith.index_cast %c14_i32 : i32 to index
    %c0_97 = arith.constant 0 : index
    %261 = vector.load %arg3[%260, %c0_97] : memref<16x128xf32, #tpu.memory_space<vmem>>, vector<1x128xf32>
    tpu.vector_store %arg3[%260, %c0_97], %256 {strides = array<i32>} : memref<16x128xf32, #tpu.memory_space<vmem>>, vector<1x128xf32>,
    %c15_i32 = arith.constant 15 : i32
    %262 = arith.addf %247, %259 : vector<1x128xf32>
    %cst_98 = arith.constant 0.36787945 : f32
    %263 = vector.broadcast %cst_98 : f32 to vector<1x128xf32>
    %264 = arith.mulf %263, %262 : vector<1x128xf32>
    %265 = arith.index_cast %c15_i32 : i32 to index
    %c0_99 = arith.constant 0 : index
    %266 = vector.load %arg4[%265, %c0_99] : memref<16x128xf32, #tpu.memory_space<vmem>>, vector<1x128xf32>
    %cst_100 = arith.constant -54.3656349 : f32
    %267 = vector.broadcast %cst_100 : f32 to vector<1x128xf32>
    %268 = arith.mulf %267, %264 : vector<1x128xf32>
    %269 = arith.addf %266, %268 : vector<1x128xf32>
    %cst_101 = arith.constant 1.000000e+01 : f32
    %270 = vector.broadcast %cst_101 : f32 to vector<1x128xf32>
    %271 = arith.cmpf oge, %269, %270 : vector<1x128xf32>
    %272 = arith.extui %271 : vector<1x128xi1> to vector<1x128xi32>
    %273 = arith.sitofp %272 : vector<1x128xi32> to vector<1x128xf32>
    %cst_102 = arith.constant 0.36787945 : f32
    %274 = vector.broadcast %cst_102 : f32 to vector<1x128xf32>
    %275 = arith.mulf %274, %259 : vector<1x128xf32>
    %276 = arith.addf %275, %273 : vector<1x128xf32>
    %277 = arith.index_cast %c15_i32 : i32 to index
    %c0_103 = arith.constant 0 : index
    %278 = vector.load %arg3[%277, %c0_103] : memref<16x128xf32, #tpu.memory_space<vmem>>, vector<1x128xf32>
    tpu.vector_store %arg3[%277, %c0_103], %273 {strides = array<i32>} : memref<16x128xf32, #tpu.memory_space<vmem>>, vector<1x128xf32>,
    %c16_i32 = arith.constant 16 : i32
    return
  }
  func.func @transform_0(%arg0: i32) -> (i32, i32, i32) {
    %c0_i32 = arith.constant 0 : i32
    %c0_i32_0 = arith.constant 0 : i32
    %c0_i32_1 = arith.constant 0 : i32
    return %c0_i32, %c0_i32_0, %arg0 : i32, i32, i32
  }
  func.func @transform_1(%arg0: i32) -> (i32, i32) {
    %c0_i32 = arith.constant 0 : i32
    %c0_i32_0 = arith.constant 0 : i32
    %c0_i32_1 = arith.constant 0 : i32
    return %c0_i32, %c0_i32_0 : i32, i32
  }
  func.func @transform_2(%arg0: i32) -> (i32, i32) {
    %c0_i32 = arith.constant 0 : i32
    %c0_i32_0 = arith.constant 0 : i32
    return %c0_i32, %arg0 : i32, i32
  }
}

</mosaic_0001>

<bundles_post_ra>
// kernel: tpu_custom_call.1
= control target key start
LH: loop header
LB: loop body
LE: loop exit
PB: predicated region body
PF: predicated region fallthrough
CT: control target
= control target key end

     0   :  { %7 = vsyncpa [#allocation4], 0  ;;  %s1106_s0 = inlined_call_operand.hbm [shape: bf16[16,16,256], index: 0, kind: input, shape index: {}]   ;;  %s1107_s1 = inlined_call_operand.hbm [shape: f32[16,16], index: 1, kind: input, shape index: {}]   ;;  %s1108_s2 = inlined_call_operand.hbm [shape: f32[16,256], index: 2, kind: output, shape index: {}]  }
   0x1   :  { %9 = vsyncpa [#allocation4 + $0x1], 0 }
   0x2   :  { %10 = vsyncpa [#allocation7], 0 }
   0x3   :  { %11 = vsyncpa [#allocation5], 0 }
   0x4   :  { %13 = vsyncpa [#allocation5 + $0x1], 0  ;;  %s909_s9 = smov 0   ;;  %s911_s10 = smov 0  }
   0x5   :  { %s913_s11 = smov 0   ;;  %s915_s12 = smov 0  }
   0x6 LB: > { %s930_s13 = sadd.s32 4294967295, %s883_s12   ;;  %s575_s14 = sadd.s32 4294967294, %s883_s12   ;;  %s883_s12 = sphi %s915_s12, %s1118_s12   ;;  %s879_s11 = sphi %s913_s11, %s1117_s11   ;;  %s875_s10 = sphi %s911_s10, %s1116_s10   ;;  %s871_s9 = sphi %s909_s9, %s1115_s9  }
   0x7   : > { %p39_p0 = scmp.ne.s32.totalorder %s875_s10, %s871_s9  ;;  %p40_p1 = scmp.eq.s32.totalorder %s930_s13, 0 }
   0x8   : > { %p84_p2 = scmp.eq.s32.totalorder %s930_s13, 1  ;;  %p90_p3 = scmp.eq.s32.totalorder %s575_s14, 1 }
   0x9   : > { %p939_p4 = por %p40_p1, %p39_p0  ;;  %p576_p5 = scmp.ge.s32.totalorder %s883_s12, 1 }
   0xa   : > { %p944_p6 = por %p90_p3, %p39_p0  ;;  %p97_p7 = scmp.lt.s32.totalorder %s883_s12, 3 }
   0xb   : > { %s108_s19 = sshll.u32 %s1107_s1, 4  ;;  %s885_s21 = smov [#allocation6]   ;;  %s109_s19 = int_to_ptr.hbm [resolvable:$true] %s108_s19 }
   0xc   : > { %p952_p8 = pnand %p576_p5, %p97_p7  ;;  %s110_s22 = sshll.u32 %s885_s21, 4  ;;  %s111_s22 = int_to_ptr.vmem [resolvable:$true] %s110_s22 }
   0xd   : > { %s962_s23 = sadd.s32 1, %s883_s12   ;;  %s886_s24 = smov 128  }
   0xe   : > { %p696_p9 = pneg %p952_p8  ;;  %s887_s25 = smov 8  }
   0xf   : > { %s23_s26 = ssub.s32 %s883_s12, %s962_s23  ;;  %s26_s27 = sadd.s32 1, %s879_s11 }
  0x10   : > { %p697_p10 = pnand %p696_p9, %p40_p1  ;;  %p24_p12 = scmp.eq.s32.totalorder %s23_s26, 0 }
  0x11   : > { %p33_p13 = scmp.ne.s32.totalorder %s879_s11, %s875_s10  ;;  %p34_p0 = scmp.eq.s32.totalorder %s883_s12, 0 }
  0x12   : > { %699 = dma.hbm_to_vmem [thread:$0]  (!%p697_p10), %s109_s19, 256, %s111_s22, [#allocation7], %s886_s24, %s886_s24, %s887_s25  }
  0x13   : > { %p709_p3 = scmp.lt.s32.totalorder %s883_s12, 2  ;;  %p35_p5 = por %p34_p0, %p33_p13 }
  0x14   : > { %s974_s28 = scalar_select %p24_p12, %s879_s11, %s26_s27  }
  0x15   : > { %p978_p7 = por %p84_p2, %p33_p13  ;;  %s124_s30 = sand.u32 1, %s879_s11  }
  0x16   : > { %s580_s3 = sshll.u32 %s883_s12, 2  ;;  %s579_s4 = sshll.u32 %s124_s30, 7 }
  0x17   : > { %s132_s7 = scalar_lea.hbm %s1106_s0, %s580_s3  ;;  %s128_s14 = scalar_lea.vmem [#allocation3], %s579_s4 }
  0x18   : > { %s133_s8 = sshll.u32 %s132_s7, 4  ;;  %s135_s17 = sshll.u32 %s128_s14, 4  ;;  %s134_s8 = int_to_ptr.hbm [resolvable:$true] %s133_s8  ;;  %s136_s17 = int_to_ptr.vmem [resolvable:$true] %s135_s17 }
  0x19   : > { %p989_p9 = pnand %p709_p3, %p35_p5  ;;  %s125_s19 = scalar_lea.sflag [#allocation4], %s124_s30 }
  0x1a   : > { %s783_s21 = sshra.s32 %s134_s8, 4  ;;  %s790_s27 = scalar_lea.hbm %s1106_s0, 256  ;;  %s784_s21 = int_to_ptr.hbm [resolvable:$true] %s783_s21 }
  0x1b   : > { %s785_s22 = scalar_lea.hbm %s784_s21, 128  ;;  %p787_p10 = pneg %p989_p9 }
  0x1c   : > { %p786_p2 = scmp.ne.s32.totalorder %s784_s21, %s785_s22  ;;  %p791_p0 = scmp.lt.s32.totalorder %s784_s21, %s1106_s0 }
  0x1d   : > { %p792_p3 = scmp.lt.s32.totalorder %s790_s27, %s785_s22 }
  0x1e   : > { %p788_p12 = pnand %p787_p10, %p786_p2 }
  0x1f   : > { %p793_p5 = por %p792_p3, %p791_p0 }
  0x20   : > { %p789_p13 = pneg %p788_p12 }
  0x22   : > { %p794_p11 = pnand %p793_p5, %p789_p13 }
  0x24   : > { %797 = shalt.err (!%p794_p11)
}
  0x25   : > { %s888_s30 = smov 64   ;;  %s889_s5 = smov 4  }
  0x26   : > { %703 = dma.hbm_to_vmem [thread:$0]  (!%p989_p9), %s134_s8, 2048, %s136_s17, %s125_s19, %s886_s24, %s888_s30, %s889_s5  }
  0x27   : > { %147 = sbr.rel (%p952_p8) target bundleno = 400 (0x190), region = 28  ;;  %s1007_s6 = sand.u32 (!%p952_p8), 1, %s875_s10  }
  0x28   : > { %s582_s7 = sshll.u32 (!%p952_p8), %s1007_s6, 7  ;;  %s150_s14 = scalar_lea.sflag (!%p952_p8), [#allocation4], %s1007_s6 }
  0x29   : > { %s1011_s21 = scalar_lea.vmem (!%p952_p8), [#allocation3], %s582_s7 }
  0x2c   : > { %858 = dma.done.wait (%p939_p4), %s150_s14, 2048  }
  0x2d   : > { %860 = vsyncadd (%p939_p4), %s150_s14, 4294965248 }
  0x2e   : > { %862 = dma.done.wait (%p40_p1), [#allocation7], 256  }
  0x2f   : > { %864 = vsyncadd (%p40_p1), [#allocation7], 4294967040  ;;  %v608_v0 = vld [vmem:[%s1011_s21] sm:$0xff]   ;;  %v671_v1 = vld [vmem:[%s1011_s21 + $0x8] sm:$0xff]   ;;  %vm276_vm0 = vcmask 130048   ;;  %s584_s15 = sshll.u32 %s1007_s6, 4 }
  0x30   : > { %v672_v2 = vld [vmem:[%s1011_s21 + $0x10] sm:$0xff]   ;;  %v610_v3 = vunpack.c.h.bf16 %v608_v0  ;;  %v614_v4 = vunpack.c.h.bf16 %v671_v1  ;;  %v673_v6 = vld [vmem:[%s1011_s21 + $0x18] sm:$0xff]   ;;  %v674_v7 = vld [vmem:[%s1011_s21 + $0x20] sm:$0xff]   ;;  %v609_v14 = vunpack.c.l.bf16 %v608_v0  ;;  %v613_v15 = vunpack.c.l.bf16 %v671_v1  ;;  %s1039_s20 = scalar_lea.vmem [#allocation8], %s584_s15  ;;  %s604_s24 = sshll.u32 %s930_s13, 3 }
  0x31   : > { %v618_v5 = vunpack.c.h.bf16 %v672_v2  ;;  %v622_v8 = vunpack.c.h.bf16 %v673_v6  ;;  %v675_v10 = vld [vmem:[%s1011_s21 + $0x28] sm:$0xff]   ;;  %v626_v11 = vunpack.c.h.bf16 %v674_v7  ;;  %v676_v13 = vld [vmem:[%s1011_s21 + $0x30] sm:$0xff]   ;;  %v677_v18 = vld [vmem:[%s1011_s21 + $0x38] sm:$0xff]   ;;  %v617_v19 = vunpack.c.l.bf16 %v672_v2  ;;  %s488_s18 = scalar_lea.hbm %s1108_s2, %s604_s24  ;;  %s489_s19 = sshll.u32 %s1039_s20, 4  ;;  %s490_s19 = int_to_ptr.vmem [resolvable:$true] %s489_s19 }
  0x32   : > { %v259_v9 = vadd.f32 %v614_v4, %v610_v3  ;;  %v630_v16 = vunpack.c.h.bf16 %v675_v10  ;;  %v634_v20 = vunpack.c.h.bf16 %v676_v13  ;;  %v678_v22 = vld [vmem:[%s1011_s21 + $0x40] sm:$0xff]   ;;  %v621_v23 = vunpack.c.l.bf16 %v673_v6  ;;  %v679_v27 = vld [vmem:[%s1011_s21 + $0x48] sm:$0xff]   ;;  %v680_v32 = vld [vmem:[%s1011_s21 + $0x50] sm:$0xff]   ;;  %s491_s22 = sshll.u32 %s488_s18, 4  ;;  %s478_s25 = scalar_lea.sflag [#allocation5], %s1007_s6  ;;  %s492_s22 = int_to_ptr.hbm [resolvable:$true] %s491_s22 }
  0x33   : > { %v244_v24 = vadd.f32 %v613_v15, %v609_v14  ;;  %v638_v25 = vunpack.c.h.bf16 %v677_v18  ;;  %v625_v28 = vunpack.c.l.bf16 %v674_v7  ;;  %v642_v30 = vunpack.c.h.bf16 %v678_v22  ;;  %v681_v37 = vld [vmem:[%s1011_s21 + $0x58] sm:$0xff]   ;;  %v682_v42 = vld [vmem:[%s1011_s21 + $0x60] sm:$0xff]   ;;  %v683_v47 = vld [vmem:[%s1011_s21 + $0x68] sm:$0xff]   ;;  %s827_s13 = sshra.s32 %s492_s22, 4  ;;  %s833_s4 = scalar_lea.hbm %s1108_s2, 32  ;;  %s828_s13 = int_to_ptr.hbm [resolvable:$true] %s827_s13 }
  0x34   : > { %v260_v12 = vadd.f32 %v618_v5, %v259_v9  ;;  %v629_v33 = vunpack.c.l.bf16 %v675_v10  ;;  %v646_v35 = vunpack.c.h.bf16 %v679_v27  ;;  %v633_v38 = vunpack.c.l.bf16 %v676_v13  ;;  %v684_v52 = vld [vmem:[%s1011_s21 + $0x70] sm:$0xff]   ;;  %v685_v57 = vld [vmem:[%s1011_s21 + $0x78] sm:$0xff]   ;;  %v274_v14 = vld [vmem:[#allocation6] sm:$0xff]  ;;  %s829_s26 = scalar_lea.hbm %s828_s13, 16  ;;  %p834_p11 = scmp.lt.s32.totalorder %s828_s13, %s1108_s2 }
  0x35   : > { %v245_v29 = vadd.f32 %v617_v19, %v244_v24  ;;  %v650_v40 = vunpack.c.h.bf16 %v680_v32  ;;  %v637_v43 = vunpack.c.l.bf16 %v677_v18  ;;  %v654_v45 = vunpack.c.h.bf16 %v681_v37  ;;  %v275_v15 = vld [vmem:[#allocation6 + $0x8] sm:$0xff]  ;;  %p830_p1 = scmp.ne.s32.totalorder %s828_s13, %s829_s26  ;;  %p835_p9 = scmp.lt.s32.totalorder %s833_s4, %s829_s26 }
  0x36   : > { %v261_v17 = vadd.f32 %v622_v8, %v260_v12  ;;  %v641_v48 = vunpack.c.l.bf16 %v678_v22  ;;  %v658_v50 = vunpack.c.h.bf16 %v682_v42  ;;  %v645_v53 = vunpack.c.l.bf16 %v679_v27 }
  0x37   : > { %v246_v34 = vadd.f32 %v621_v23, %v245_v29  ;;  %v662_v55 = vunpack.c.h.bf16 %v683_v47  ;;  %v649_v58 = vunpack.c.l.bf16 %v680_v32  ;;  %v666_v60 = vunpack.c.h.bf16 %v684_v52  ;;  %p831_p4 = pnand %p830_p1, %p978_p7  ;;  %p836_p2 = por %p835_p9, %p834_p11 }
  0x38   : > { %v262_v21 = vadd.f32 %v626_v11, %v261_v17  ;;  %v653_v62 = vunpack.c.l.bf16 %v681_v37  ;;  %v670_v0 = vunpack.c.h.bf16 %v685_v57  ;;  %v657_v2 = vunpack.c.l.bf16 %v682_v42 }
  0x39   : > { %v247_v39 = vadd.f32 %v625_v28, %v246_v34  ;;  %v661_v5 = vunpack.c.l.bf16 %v683_v47  ;;  %v665_v8 = vunpack.c.l.bf16 %v684_v52  ;;  %v669_v10 = vunpack.c.l.bf16 %v685_v57  ;;  %p832_p8 = pneg %p831_p4 }
  0x3a   : > { %v263_v26 = vadd.f32 %v630_v16, %v262_v21  ;;  %v890_v18 = vmov 0.0  }
  0x3b   : > { %v248_v44 = vadd.f32 %v629_v33, %v247_v39  ;;  %p837_p10 = pnand %p836_p2, %p832_p8 }
  0x3c   : > { %v264_v31 = vadd.f32 %v634_v20, %v263_v26 }
  0x3d   : > { %v249_v49 = vadd.f32 %v633_v38, %v248_v44 }
  0x3e   : > { %v265_v36 = vadd.f32 %v638_v25, %v264_v31 }
  0x3f   : > { %v250_v54 = vadd.f32 %v637_v43, %v249_v49 }
  0x40   : > { %v266_v41 = vadd.f32 %v642_v30, %v265_v36 }
  0x41   : > { %v251_v59 = vadd.f32 %v641_v48, %v250_v54 }
  0x42   : > { %v267_v46 = vadd.f32 %v646_v35, %v266_v41 }
  0x43   : > { %v252_v63 = vadd.f32 %v645_v53, %v251_v59 }
  0x44   : > { %v268_v51 = vadd.f32 %v650_v40, %v267_v46 }
  0x45   : > { %v253_v3 = vadd.f32 %v649_v58, %v252_v63 }
  0x46   : > { %v269_v56 = vadd.f32 %v654_v45, %v268_v51 }
  0x47   : > { %v254_v6 = vadd.f32 %v653_v62, %v253_v3 }
  0x48   : > { %v270_v61 = vadd.f32 %v658_v50, %v269_v56 }
  0x49   : > { %v255_v9 = vadd.f32 %v657_v2, %v254_v6 }
  0x4a   : > { %v271_v1 = vadd.f32 %v662_v55, %v270_v61 }
  0x4b   : > { %v256_v11 = vadd.f32 %v661_v5, %v255_v9 }
  0x4c   : > { %v272_v4 = vadd.f32 %v666_v60, %v271_v1 }
  0x4d   : > { %v257_v12 = vadd.f32 %v665_v8, %v256_v11 }
  0x4e   : > { %v273_v7 = vadd.f32 %v670_v0, %v272_v4 }
  0x4f   : > { %v258_v13 = vadd.f32 %v669_v10, %v257_v12 }
  0x50   : > { %297 = vmatpush.msra.mxu0 %v273_v7  ;;  %686 = vmatpush.msra.mxu1 %v273_v7 }
  0x52   : > { %298 = vmatpush.msra.mxu0 %v258_v13  ;;  %687 = vmatpush.msra.mxu1 %v258_v13 }
  0x53   : > { %585 = vmatmul.msk.f32.vlgmr.msra.gmra.mxu0 %vm276_vm0, %v274_v14  ;;  %586 = vmatmul.msk.f32.vlgmr.msra.gmra.mxu1 %vm276_vm0, %v275_v15 }
  0xd0   : > { %v300_v16 = vpop.f32.mrf.mxu0  ;;  %v303_v52 = vpop.f32.mrf.mxu1 }
  0xd1   : > { %306 = vst [vmem:[#allocation2] sm:$0xff] %v300_v16 }
  0xd2   : > { %307 = vst [vmem:[#allocation2 + $0x8] sm:$0xff] %v303_v52 }
  0xd8   : > { %v308_v17 = vld [vmem:[#allocation2] sm:$0x1]  ;;  %v316_v22 = vld [vmem:[#allocation2 + $0x1] sm:$0x1]  ;;  %v327_v29 = vld [vmem:[#allocation2 + $0x2] sm:$0x1] }
  0xd9   : > { %vm309_vm1 = vcmp.ge.f32.partialorder %v308_v17, 10.0  ;;  %v338_v37 = vld [vmem:[#allocation2 + $0x3] sm:$0x1]  ;;  %v349_v45 = vld [vmem:[#allocation2 + $0x4] sm:$0x1] }
  0xda   : > { %v587_v19 = vsel %vm309_vm1, 1.0, %v890_v18  ;;  %v360_v54 = vld [vmem:[#allocation2 + $0x5] sm:$0x1]  ;;  %v371_v62 = vld [vmem:[#allocation2 + $0x6] sm:$0x1] }
  0xdb   : > { %313 = vst [vmem:[%s1039_s20] sm:$0x1] %v587_v19  ;;  %v315_v20 = vmul.f32 0.36787945, %v587_v19  ;;  %v382_v6 = vld [vmem:[#allocation2 + $0x7] sm:$0x1] }
  0xdc   : > { %v393_v13 = vld [vmem:[#allocation2 + $0x8] sm:$0x1] }
  0xdd   : > { %v317_v21 = vmul.f32 -54.365635, %v315_v20 }
  0xdf   : > { %v318_v23 = vadd.f32 %v317_v21, %v316_v22 }
  0xe1   : > { %vm319_vm2 = vcmp.ge.f32.partialorder %v318_v23, 10.0  ;;  %v404_v23 = vld [vmem:[#allocation2 + $0x9] sm:$0x1] }
  0xe2   : > { %v588_v24 = vsel %vm319_vm2, 1.0, %v890_v18 }
  0xe3   : > { %v323_v25 = vadd.f32 %v588_v24, %v315_v20  ;;  %324 = vst [vmem:[%s1039_s20 + $0x1] sm:$0x1] %v588_v24 }
  0xe5   : > { %v325_v26 = vadd.f32 %v323_v25, %v315_v20  ;;  %v333_v31 = vmul.f32 0.36787945, %v323_v25 }
  0xe7   : > { %v326_v27 = vmul.f32 0.36787945, %v325_v26 }
  0xe9   : > { %v328_v28 = vmul.f32 -54.365635, %v326_v27 }
  0xeb   : > { %v329_v30 = vadd.f32 %v328_v28, %v327_v29 }
  0xed   : > { %vm330_vm3 = vcmp.ge.f32.partialorder %v329_v30, 10.0 }
  0xee   : > { %v589_v32 = vsel %vm330_vm3, 1.0, %v890_v18 }
  0xef   : > { %v334_v33 = vadd.f32 %v589_v32, %v333_v31  ;;  %335 = vst [vmem:[%s1039_s20 + $0x2] sm:$0x1] %v589_v32  ;;  %v415_v31 = vld [vmem:[#allocation2 + $0xa] sm:$0x1] }
  0xf1   : > { %v336_v34 = vadd.f32 %v334_v33, %v326_v27  ;;  %v344_v39 = vmul.f32 0.36787945, %v334_v33 }
  0xf3   : > { %v337_v35 = vmul.f32 0.36787945, %v336_v34 }
  0xf5   : > { %v339_v36 = vmul.f32 -54.365635, %v337_v35 }
  0xf7   : > { %v340_v38 = vadd.f32 %v339_v36, %v338_v37 }
  0xf9   : > { %vm341_vm4 = vcmp.ge.f32.partialorder %v340_v38, 10.0 }
  0xfa   : > { %v590_v40 = vsel %vm341_vm4, 1.0, %v890_v18 }
  0xfb   : > { %v345_v41 = vadd.f32 %v590_v40, %v344_v39  ;;  %346 = vst [vmem:[%s1039_s20 + $0x3] sm:$0x1] %v590_v40  ;;  %v426_v39 = vld [vmem:[#allocation2 + $0xb] sm:$0x1] }
  0xfd   : > { %v347_v42 = vadd.f32 %v345_v41, %v337_v35  ;;  %v355_v47 = vmul.f32 0.36787945, %v345_v41 }
  0xff   : > { %v348_v43 = vmul.f32 0.36787945, %v347_v42 }
 0x101   : > { %v350_v44 = vmul.f32 -54.365635, %v348_v43 }
 0x103   : > { %v351_v46 = vadd.f32 %v350_v44, %v349_v45 }
 0x105   : > { %vm352_vm5 = vcmp.ge.f32.partialorder %v351_v46, 10.0 }
 0x106   : > { %v591_v48 = vsel %vm352_vm5, 1.0, %v890_v18 }
 0x107   : > { %v356_v49 = vadd.f32 %v591_v48, %v355_v47  ;;  %357 = vst [vmem:[%s1039_s20 + $0x4] sm:$0x1] %v591_v48  ;;  %v437_v47 = vld [vmem:[#allocation2 + $0xc] sm:$0x1] }
 0x109   : > { %v358_v50 = vadd.f32 %v356_v49, %v348_v43  ;;  %v366_v56 = vmul.f32 0.36787945, %v356_v49 }
 0x10b   : > { %v359_v51 = vmul.f32 0.36787945, %v358_v50 }
 0x10d   : > { %v361_v53 = vmul.f32 -54.365635, %v359_v51 }
 0x10f   : > { %v362_v55 = vadd.f32 %v361_v53, %v360_v54 }
 0x111   : > { %vm363_vm6 = vcmp.ge.f32.partialorder %v362_v55, 10.0  ;;  %v448_v55 = vld [vmem:[#allocation2 + $0xd] sm:$0x1] }
 0x112   : > { %v592_v57 = vsel %vm363_vm6, 1.0, %v890_v18 }
 0x113   : > { %v367_v58 = vadd.f32 %v592_v57, %v366_v56  ;;  %368 = vst [vmem:[%s1039_s20 + $0x5] sm:$0x1] %v592_v57 }
 0x115   : > { %v369_v59 = vadd.f32 %v367_v58, %v359_v51  ;;  %v377_v0 = vmul.f32 0.36787945, %v367_v58 }
 0x117   : > { %v370_v60 = vmul.f32 0.36787945, %v369_v59 }
 0x119   : > { %v372_v61 = vmul.f32 -54.365635, %v370_v60 }
 0x11b   : > { %v373_v63 = vadd.f32 %v372_v61, %v371_v62 }
 0x11d   : > { %vm374_vm7 = vcmp.ge.f32.partialorder %v373_v63, 10.0  ;;  %v459_v63 = vld [vmem:[#allocation2 + $0xe] sm:$0x1] }
 0x11e   : > { %v593_v1 = vsel %vm374_vm7, 1.0, %v890_v18 }
 0x11f   : > { %v378_v2 = vadd.f32 %v593_v1, %v377_v0  ;;  %379 = vst [vmem:[%s1039_s20 + $0x6] sm:$0x1] %v593_v1 }
 0x121   : > { %v380_v3 = vadd.f32 %v378_v2, %v370_v60  ;;  %v388_v8 = vmul.f32 0.36787945, %v378_v2 }
 0x123   : > { %v381_v4 = vmul.f32 0.36787945, %v380_v3 }
 0x125   : > { %v383_v5 = vmul.f32 -54.365635, %v381_v4 }
 0x127   : > { %v384_v7 = vadd.f32 %v383_v5, %v382_v6 }
 0x129   : > { %vm385_vm8 = vcmp.ge.f32.partialorder %v384_v7, 10.0  ;;  %v470_v7 = vld [vmem:[#allocation2 + $0xf] sm:$0x1] }
 0x12a   : > { %v594_v9 = vsel %vm385_vm8, 1.0, %v890_v18 }
 0x12b   : > { %v389_v10 = vadd.f32 %v594_v9, %v388_v8  ;;  %390 = vst [vmem:[%s1039_s20 + $0x7] sm:$0x1] %v594_v9 }
 0x12d   : > { %v391_v11 = vadd.f32 %v389_v10, %v381_v4  ;;  %v399_v16 = vmul.f32 0.36787945, %v389_v10 }
 0x12f   : > { %v392_v12 = vmul.f32 0.36787945, %v391_v11 }
 0x131   : > { %v394_v14 = vmul.f32 -54.365635, %v392_v12 }
 0x133   : > { %v395_v15 = vadd.f32 %v394_v14, %v393_v13 }
 0x135   : > { %vm396_vm9 = vcmp.ge.f32.partialorder %v395_v15, 10.0 }
 0x136   : > { %v595_v17 = vsel %vm396_vm9, 1.0, %v890_v18 }
 0x137   : > { %v400_v19 = vadd.f32 %v595_v17, %v399_v16  ;;  %401 = vst [vmem:[%s1039_s20 + $0x8] sm:$0x1] %v595_v17 }
 0x139   : > { %v402_v20 = vadd.f32 %v400_v19, %v392_v12  ;;  %v410_v25 = vmul.f32 0.36787945, %v400_v19 }
 0x13b   : > { %v403_v21 = vmul.f32 0.36787945, %v402_v20 }
 0x13d   : > { %v405_v22 = vmul.f32 -54.365635, %v403_v21 }
 0x13f   : > { %v406_v24 = vadd.f32 %v405_v22, %v404_v23 }
 0x141   : > { %vm407_vm10 = vcmp.ge.f32.partialorder %v406_v24, 10.0 }
 0x142   : > { %v596_v26 = vsel %vm407_vm10, 1.0, %v890_v18 }
 0x143   : > { %v411_v27 = vadd.f32 %v596_v26, %v410_v25  ;;  %412 = vst [vmem:[%s1039_s20 + $0x9] sm:$0x1] %v596_v26 }
 0x145   : > { %v413_v28 = vadd.f32 %v411_v27, %v403_v21  ;;  %v421_v33 = vmul.f32 0.36787945, %v411_v27 }
 0x147   : > { %v414_v29 = vmul.f32 0.36787945, %v413_v28 }
 0x149   : > { %v416_v30 = vmul.f32 -54.365635, %v414_v29 }
 0x14b   : > { %v417_v32 = vadd.f32 %v416_v30, %v415_v31 }
 0x14d   : > { %vm418_vm11 = vcmp.ge.f32.partialorder %v417_v32, 10.0 }
 0x14e   : > { %v597_v34 = vsel %vm418_vm11, 1.0, %v890_v18 }
 0x14f   : > { %v422_v35 = vadd.f32 %v597_v34, %v421_v33  ;;  %423 = vst [vmem:[%s1039_s20 + $0xa] sm:$0x1] %v597_v34 }
 0x151   : > { %v424_v36 = vadd.f32 %v422_v35, %v414_v29  ;;  %v432_v41 = vmul.f32 0.36787945, %v422_v35 }
 0x153   : > { %v425_v37 = vmul.f32 0.36787945, %v424_v36 }
 0x155   : > { %v427_v38 = vmul.f32 -54.365635, %v425_v37 }
 0x157   : > { %v428_v40 = vadd.f32 %v427_v38, %v426_v39 }
 0x159   : > { %vm429_vm12 = vcmp.ge.f32.partialorder %v428_v40, 10.0 }
 0x15a   : > { %v598_v42 = vsel %vm429_vm12, 1.0, %v890_v18 }
 0x15b   : > { %v433_v43 = vadd.f32 %v598_v42, %v432_v41  ;;  %434 = vst [vmem:[%s1039_s20 + $0xb] sm:$0x1] %v598_v42 }
 0x15d   : > { %v435_v44 = vadd.f32 %v433_v43, %v425_v37  ;;  %v443_v49 = vmul.f32 0.36787945, %v433_v43 }
 0x15f   : > { %v436_v45 = vmul.f32 0.36787945, %v435_v44 }
 0x161   : > { %v438_v46 = vmul.f32 -54.365635, %v436_v45 }
 0x163   : > { %v439_v48 = vadd.f32 %v438_v46, %v437_v47 }
 0x165   : > { %vm440_vm13 = vcmp.ge.f32.partialorder %v439_v48, 10.0 }
 0x166   : > { %v599_v50 = vsel %vm440_vm13, 1.0, %v890_v18 }
 0x167   : > { %v444_v51 = vadd.f32 %v599_v50, %v443_v49  ;;  %445 = vst [vmem:[%s1039_s20 + $0xc] sm:$0x1] %v599_v50 }
 0x169   : > { %v446_v52 = vadd.f32 %v444_v51, %v436_v45  ;;  %v454_v57 = vmul.f32 0.36787945, %v444_v51 }
 0x16b   : > { %v447_v53 = vmul.f32 0.36787945, %v446_v52 }
 0x16d   : > { %v449_v54 = vmul.f32 -54.365635, %v447_v53 }
 0x16f   : > { %v450_v56 = vadd.f32 %v449_v54, %v448_v55 }
 0x171   : > { %vm451_vm14 = vcmp.ge.f32.partialorder %v450_v56, 10.0 }
 0x172   : > { %v600_v58 = vsel %vm451_vm14, 1.0, %v890_v18 }
 0x173   : > { %v455_v59 = vadd.f32 %v600_v58, %v454_v57  ;;  %456 = vst [vmem:[%s1039_s20 + $0xd] sm:$0x1] %v600_v58 }
 0x175   : > { %v457_v60 = vadd.f32 %v455_v59, %v447_v53  ;;  %v465_v1 = vmul.f32 0.36787945, %v455_v59 }
 0x177   : > { %v458_v61 = vmul.f32 0.36787945, %v457_v60 }
 0x179   : > { %v460_v62 = vmul.f32 -54.365635, %v458_v61 }
 0x17b   : > { %v461_v0 = vadd.f32 %v460_v62, %v459_v63 }
 0x17d   : > { %vm462_vm15 = vcmp.ge.f32.partialorder %v461_v0, 10.0 }
 0x17e   : > { %v601_v2 = vsel %vm462_vm15, 1.0, %v890_v18 }
 0x17f   : > { %v466_v3 = vadd.f32 %v601_v2, %v465_v1  ;;  %467 = vst [vmem:[%s1039_s20 + $0xe] sm:$0x1] %v601_v2 }
 0x181   : > { %v468_v4 = vadd.f32 %v466_v3, %v458_v61 }
 0x183   : > { %v469_v5 = vmul.f32 0.36787945, %v468_v4 }
 0x185   : > { %v471_v6 = vmul.f32 -54.365635, %v469_v5 }
 0x187   : > { %v472_v8 = vadd.f32 %v471_v6, %v470_v7 }
 0x189   : > { %vm473_vm0 = vcmp.ge.f32.partialorder %v472_v8, 10.0 }
 0x18a   : > { %v602_v9 = vsel %vm473_vm0, 1.0, %v890_v18 }
 0x18b   : > { %476 = vst [vmem:[%s1039_s20 + $0xf] sm:$0x1] %v602_v9 }
 0x18c   : > { %840 = shalt.err (!%p837_p10)
}
 0x18d   : > { %s891_s6 = smov 128   ;;  %s892_s7 = smov 256  }
 0x18e   : > { %s893_s14 = smov 8  }
 0x18f   : > { %694 = dma.vmem_to_hbm [thread:$0]  (%p978_p7), %s490_s19, 256, %s492_s22, %s478_s25, %s891_s6, %s892_s7, %s893_s14  }
 0x190 PF: > { %s506_s21 = sand.u32 1, %s871_s9   ;;  %p1114_p12 = scmp.ge.s32.totalorder %s883_s12, 2 }
 0x191   : > { %s507_s15 = scalar_lea.sflag [#allocation5], %s506_s21 }
 0x192   : > { %p705_p13 = pnand %p1114_p12, %p944_p6 }
 0x194   : > { %p706_p0 = pneg %p705_p13 }
 0x196   : > { %866 = dma.done.wait (%p706_p0), %s507_s15, 256  }
 0x197   : > { %868 = vsyncadd (%p706_p0), %s507_s15, 4294967040  ;;  %p16_p3 = scmp.ge.s32.totalorder %s962_s23, 4   ;;  %s1115_s9 = smov %s875_s10 }
 0x198   : > { %s1116_s10 = smov %s879_s11  ;;  %s1117_s11 = smov %s974_s28 }
 0x199   : > { %s1118_s12 = smov %s962_s23  ;;  %18 = sbr.rel (!%p16_p3) target bundleno = 6 (0x6), region = 77 }
 0x19e   :  { %513 = vsyncpa [#allocation4], 1 }
 0x19f   :  { %515 = vsyncpa [#allocation4 + $0x1], 1 }
 0x1a0   :  { %516 = vsyncpa [#allocation7], 1 }
 0x1a1   :  { %517 = vsyncpa [#allocation5], 1 }
 0x1a2   :  { %519 = vsyncpa [#allocation5 + $0x1], 1 }

</bundles_post_ra>
